<compile_context>
chip_gen: v7x
topology: tpu7x:2x2x1
jax: 0.10.0
libtpu: 0.0.40
codegen_flags: <defaults>
</compile_context>

<pallas_src>
import functools

import jax
import jax.numpy as jnp
import numpy as np
from jax.experimental import pallas as pl
from jax.experimental.pallas import tpu as pltpu

OUT_LANES = 128  # packed output row is padded to a lane-dense multiple of 128


def online_gru_kernel(
    # per-step input (block index follows the grid step t): [x_t | ext_t]
    xe_ref,
    # resident inputs (constant index_map -> fetched once, stay in VMEM)
    h0_ref, w_comb_ref, w_ih_ref, w_heads_ref, b_ref,
    # single packed, lane-dense output row for this step
    out_ref,
    # VMEM scratch: hidden state, persists across grid steps
    h_scr,
    *, I, E, H, NH,
):
    f32 = jnp.float32
    t = pl.program_id(0)

    @pl.when(t == 0)
    def _():
        h_scr[...] = h0_ref[...]

    xe = xe_ref[0]      # (1, I+E)
    h = h_scr[...]      # (1, H)

    # packed bias slab:
    #   row0 = [b_hh (3H) | b_attn (E)]   (matches the fused matmul 1 output)
    #   row1 = b_ih (3H)
    #   row2 = heads bias [pred | value | termination(-2.0) | output] (NH)
    b_all = b_ref[...]
    b_comb = b_all[0:1, 0:3 * H + E]
    b_ih = b_all[1:2, 0:3 * H]
    b_heads = b_all[2:3, 0:NH]

    # ---- fused matmul 1: [gh | attn_logits] = [h | x | ext] @ W_comb ------
    lhs = jnp.concatenate([h, xe], axis=-1)                # (1, H+I+E)
    ga = jnp.dot(lhs, w_comb_ref[...],
                 preferred_element_type=f32) + b_comb      # (1, 3H+E)
    gh = ga[:, 0:3 * H]                                    # h @ W_hh + b_hh
    attn_w = jax.nn.sigmoid(ga[:, 3 * H:3 * H + E])        # attention weights

    # attended combined input [x | attn_w * ext] without slicing xe:
    gate = jnp.concatenate([jnp.ones((1, I), f32), attn_w], axis=-1)
    comb = xe * gate                                        # (1, I+E)

    # ---- fused matmul 2: gi = comb @ W_ih + b_ih (r|z|n packed on lanes) --
    gi = jnp.dot(comb, w_ih_ref[...], preferred_element_type=f32) + b_ih

    # ---- GRU cell (PyTorch gate order r, z, n) ----
    r = jax.nn.sigmoid(gi[:, 0:H] + gh[:, 0:H])
    z = jax.nn.sigmoid(gi[:, H:2 * H] + gh[:, H:2 * H])
    n = jnp.tanh(gi[:, 2 * H:3 * H] + r * gh[:, 2 * H:3 * H])
    h_new = (1.0 - z) * n + z * h

    # ---- fused matmul 3: heads = [prediction | value | term_logit | output]
    heads = jnp.dot(h_new, w_heads_ref[...],
                    preferred_element_type=f32) + b_heads
    term_prob = jax.nn.sigmoid(heads[:, E + 1:E + 2])       # EUP slot, free

    # carry hidden state to the next grid step
    h_scr[...] = h_new

    # single lane-dense store: [h_new | attn_w | heads | term_prob | zero pad]
    used = H + E + NH + 1
    pieces = [h_new, attn_w, heads, term_prob]
    pad_w = out_ref.shape[-1] - used
    if pad_w > 0:
        pieces.append(jnp.zeros((1, pad_w), f32))
    out_ref[0] = jnp.concatenate(pieces, axis=-1)


def init_params(key, input_size, ext_size, hidden_size, output_size):
    """Logical parameters, stored transposed as (in, out) vs. nn.Linear/nn.GRU."""
    ks = iter(jax.random.split(key, 16))
    s = lambda shape: (0.1 * jax.random.normal(next(ks), shape)).astype(jnp.float32)
    I, E, H, O = input_size, ext_size, hidden_size, output_size
    return dict(
        wa=s((E, E)), ba=s((1, E)),                    # attention_layer
        w_ih=s((I + E, 3 * H)), b_ih=s((1, 3 * H)),    # gru weight_ih_l0.T / bias_ih (r|z|n)
        w_hh=s((H, 3 * H)), b_hh=s((1, 3 * H)),        # gru weight_hh_l0.T / bias_hh
        wp=s((H, E)), bp=s((1, E)),                    # prediction_layer
        wv=s((H, 1)), bv=s((1, 1)),                    # value_head
        wt=s((H, 1)),
        bt=jnp.full((1, 1), -2.0, dtype=jnp.float32),  # termination_head bias = -2.0
        wo=s((H, O)), bo=s((1, O)),                    # output_layer
    )


def pack_params(p):
    """One-time packing (done outside the kernel)."""
    I_plus_E = p["w_ih"].shape[0]
    H = p["w_hh"].shape[0]
    E = p["wa"].shape[0]
    I = I_plus_E - E

    # heads fused along lanes: [prediction | value | termination | output]
    w_heads = jnp.concatenate([p["wp"], p["wv"], p["wt"], p["wo"]], axis=1)  # (H, NH)
    b_heads = jnp.concatenate([p["bp"], p["bv"], p["bt"], p["bo"]], axis=1)  # (1, NH)
    NH = w_heads.shape[1]

    # block-diagonal fusion of the GRU hidden path and the attention layer:
    #   [h | x | ext] @ W_comb -> [gh (3H) | attn_logits (E)]
    K = H + I + E
    n_comb = 3 * H + E
    w_comb = jnp.zeros((K, n_comb), jnp.float32)
    w_comb = w_comb.at[0:H, 0:3 * H].set(p["w_hh"])
    w_comb = w_comb.at[H + I:K, 3 * H:n_comb].set(p["wa"])

    # packed bias slab (one DMA)
    bw = max(n_comb, 3 * H, NH)
    b_all = jnp.zeros((3, bw), jnp.float32)
    b_all = b_all.at[0, 0:3 * H].set(p["b_hh"][0])
    b_all = b_all.at[0, 3 * H:n_comb].set(p["ba"][0])
    b_all = b_all.at[1, 0:3 * H].set(p["b_ih"][0])
    b_all = b_all.at[2, 0:NH].set(b_heads[0])

    return dict(w_comb=w_comb, w_ih=p["w_ih"], w_heads=w_heads, b_all=b_all)


@jax.jit
def online_gru_sequence(packed, x_seq, ext_seq, h0):
    """Run T online-GRU steps in ONE pallas_call.

    Weights are resident in VMEM across all steps; the hidden state lives in a
    VMEM scratch accumulator. x_seq: (T, I); ext_seq: (T, E); h0: (H,).
    """
    T, I = x_seq.shape
    E = ext_seq.shape[-1]
    H = h0.shape[-1]
    NH = packed["w_heads"].shape[-1]   # E + 1 + 1 + O
    O = NH - E - 2
    used = H + E + NH + 1
    out_w = ((used + OUT_LANES - 1) // OUT_LANES) * OUT_LANES

    xe = jnp.concatenate([x_seq, ext_seq], axis=-1).reshape(T, 1, I + E)
    xe = xe.astype(jnp.float32)
    h0r = h0.reshape(1, H).astype(jnp.float32)

    kernel = functools.partial(online_gru_kernel, I=I, E=E, H=H, NH=NH)

    packed_out = pl.pallas_call(
        kernel,
        out_shape=jax.ShapeDtypeStruct((T, 1, out_w), jnp.float32),
        grid_spec=pltpu.PrefetchScalarGridSpec(
            num_scalar_prefetch=0,
            grid=(T,),
            in_specs=[
                pl.BlockSpec((1, 1, I + E), lambda t: (t, 0, 0)),         # [x|ext]_t
                pl.BlockSpec((1, H), lambda t: (0, 0)),                   # h0 (resident)
                pl.BlockSpec(packed["w_comb"].shape, lambda t: (0, 0)),   # resident weights
                pl.BlockSpec(packed["w_ih"].shape, lambda t: (0, 0)),
                pl.BlockSpec(packed["w_heads"].shape, lambda t: (0, 0)),
                pl.BlockSpec(packed["b_all"].shape, lambda t: (0, 0)),
            ],
            out_specs=pl.BlockSpec((1, 1, out_w), lambda t: (t, 0, 0)),
            scratch_shapes=[pltpu.VMEM((1, H), jnp.float32)],             # hidden carry
        ),
        compiler_params=pltpu.CompilerParams(
            dimension_semantics=("arbitrary",)),   # recurrence is sequential
    )(xe, h0r, packed["w_comb"], packed["w_ih"], packed["w_heads"],
      packed["b_all"])

    row = packed_out[:, 0, :]   # (T, out_w)
    return dict(
        hidden=row[:, 0:H],
        attention=row[:, H:H + E],
        prediction=row[:, H + E:H + 2 * E],
        value=row[:, H + 2 * E],
        term_logit=row[:, H + 2 * E + 1],
        output=row[:, H + 2 * E + 2:H + 2 * E + 2 + O],
        term_prob=row[:, H + 2 * E + 2 + O],
    )


def online_gru_forward(packed, x, external_input, hidden):
    """Single online step; PyTorch-style tuple
    (output, value_estimate, state_prediction, termination_prob,
     termination_logit, attention_weights) plus the new hidden state."""
    seq = online_gru_sequence(packed, x.reshape(1, -1),
                              external_input.reshape(1, -1), hidden)
    return (seq["output"][0], seq["value"][0], seq["prediction"][0],
            seq["term_prob"][0], seq["term_logit"][0], seq["attention"][0],
            seq["hidden"][0])


def reference_step(p, x, ext, h):
    """Pure-JAX reference mirroring the PyTorch forward (single step)."""
    x = x.reshape(1, -1)
    ext = ext.reshape(1, -1)
    h = h.reshape(1, -1)
    H = h.shape[-1]
    attn_w = jax.nn.sigmoid(ext @ p["wa"] + p["ba"])
    att = attn_w * ext
    comb = jnp.concatenate([x, att], axis=-1)
    gi = comb @ p["w_ih"] + p["b_ih"]
    gh = h @ p["w_hh"] + p["b_hh"]
    r = jax.nn.sigmoid(gi[:, 0:H] + gh[:, 0:H])
    z = jax.nn.sigmoid(gi[:, H:2 * H] + gh[:, H:2 * H])
    n = jnp.tanh(gi[:, 2 * H:] + r * gh[:, 2 * H:])
    h_new = (1.0 - z) * n + z * h
    pred = h_new @ p["wp"] + p["bp"]
    val = h_new @ p["wv"] + p["bv"]
    term = h_new @ p["wt"] + p["bt"]
    out = h_new @ p["wo"] + p["bo"]
    return dict(out=out[0], val=val[0, 0], pred=pred[0],
                term_logit=term[0, 0], term_prob=jax.nn.sigmoid(term[0, 0]),
                attn=attn_w[0], h_new=h_new[0])


if __name__ == "__main__":
    input_size = 8
    external_input_size = 6    # stand-in for len(env.get_outputs()[0])
    hidden_size = 32
    output_size = 3
    T = 5                      # small online sequence

    key = jax.random.PRNGKey(0)
    kp, kx, ke = jax.random.split(key, 3)
    logical = init_params(kp, input_size, external_input_size, hidden_size,
                          output_size)
    packed = pack_params(logical)

    x_seq = jax.random.normal(kx, (T, input_size), dtype=jnp.float32)
    ext_seq = jax.random.normal(ke, (T, external_input_size), dtype=jnp.float32)
    h0 = jnp.zeros((hidden_size,), dtype=jnp.float32)   # init_hidden()

    def check(got, want, name):
        np.testing.assert_allclose(np.asarray(got), np.asarray(want),
                                   rtol=2e-5, atol=2e-5, err_msg=name)

    # ---- single step (matches OnlineGRU.forward with execute=True) ----
    step = jax.block_until_ready(
        online_gru_forward(packed, x_seq[0], ext_seq[0], h0))
    ref0 = reference_step(logical, x_seq[0], ext_seq[0], h0)
    check(step[0], ref0["out"], "output")
    check(step[1], ref0["val"], "value_estimate")
    check(step[2], ref0["pred"], "state_prediction")
    check(step[3], ref0["term_prob"], "termination_prob")
    check(step[4], ref0["term_logit"], "termination_logit")
    check(step[5], ref0["attn"], "attention_weights")
    check(step[6], ref0["h_new"], "hidden")

    # ---- full online sequence: weights + hidden state resident in VMEM ----
    seq = jax.block_until_ready(online_gru_sequence(packed, x_seq, ext_seq, h0))
    h = h0
    refs = []
    for t in range(T):
        r = reference_step(logical, x_seq[t], ext_seq[t], h)
        refs.append(r)
        h = r["h_new"]
    check(seq["hidden"], jnp.stack([r["h_new"] for r in refs]), "hidden_seq")
    check(seq["output"], jnp.stack([r["out"] for r in refs]), "output_seq")
    check(seq["value"], jnp.stack([r["val"] for r in refs]), "value_seq")
    check(seq["prediction"], jnp.stack([r["pred"] for r in refs]), "pred_seq")
    check(seq["term_logit"], jnp.stack([r["term_logit"] for r in refs]),
          "term_logit_seq")
    check(seq["term_prob"], jnp.stack([r["term_prob"] for r in refs]),
          "term_prob_seq")
    check(seq["attention"], jnp.stack([r["attn"] for r in refs]), "attn_seq")

    print("KERNEL_OK")
</pallas_src>

<mosaic_0001>
module attributes {stable_mosaic.version = 11 : i64} {
  func.func @online_gru_kernel(%arg0: i32, %arg1: memref<1x1x14xf32, #tpu.memory_space<vmem>>, %arg2: memref<1x32xf32, #tpu.memory_space<vmem>>, %arg3: memref<46x102xf32, #tpu.memory_space<vmem>>, %arg4: memref<14x96xf32, #tpu.memory_space<vmem>>, %arg5: memref<32x11xf32, #tpu.memory_space<vmem>>, %arg6: memref<3x102xf32, #tpu.memory_space<vmem>>, %arg7: memref<1x1x128xf32, #tpu.memory_space<vmem>>, %arg8: memref<1x32xf32, #tpu.memory_space<vmem>>) attributes {dimension_semantics = [#tpu.dimension_semantics<arbitrary>], iteration_bounds = array<i64: 1>, scalar_prefetch = 0 : i64, scratch_operands = 1 : i64, tpu.core_type = #tpu.core_type<tc>, window_params = [{transform_indices = @transform_0, window_bounds = array<i64: 1, 1, 14>}, {pipeline_mode = #tpu.pipeline_mode<synchronous>, transform_indices = @transform_1, window_bounds = array<i64: 1, 32>}, {pipeline_mode = #tpu.pipeline_mode<synchronous>, transform_indices = @transform_2, window_bounds = array<i64: 46, 102>}, {pipeline_mode = #tpu.pipeline_mode<synchronous>, transform_indices = @transform_3, window_bounds = array<i64: 14, 96>}, {pipeline_mode = #tpu.pipeline_mode<synchronous>, transform_indices = @transform_4, window_bounds = array<i64: 32, 11>}, {pipeline_mode = #tpu.pipeline_mode<synchronous>, transform_indices = @transform_5, window_bounds = array<i64: 3, 102>}, {transform_indices = @transform_6, window_bounds = array<i64: 1, 1, 128>}]} {
    %c0_i32 = arith.constant 0 : i32
    %0 = arith.cmpi eq, %arg0, %c0_i32 : i32
    %1 = arith.extui %0 : i1 to i32
    %c0_i32_0 = arith.constant 0 : i32
    %2 = arith.cmpi ne, %1, %c0_i32_0 : i32
    scf.if %2 {
      %c0_27 = arith.constant 0 : index
      %c0_28 = arith.constant 0 : index
      %68 = vector.load %arg2[%c0_27, %c0_28] : memref<1x32xf32, #tpu.memory_space<vmem>>, vector<1x32xf32>
      %c0_29 = arith.constant 0 : index
      %c0_30 = arith.constant 0 : index
      %69 = vector.load %arg8[%c0_29, %c0_30] : memref<1x32xf32, #tpu.memory_space<vmem>>, vector<1x32xf32>
      tpu.vector_store %arg8[%c0_29, %c0_30], %68 {strides = array<i32>} : memref<1x32xf32, #tpu.memory_space<vmem>>, vector<1x32xf32>,
    } else {
    }
    %c0 = arith.constant 0 : index
    %c0_1 = arith.constant 0 : index
    %c0_2 = arith.constant 0 : index
    %3 = vector.load %arg1[%c0, %c0_1, %c0_2] : memref<1x1x14xf32, #tpu.memory_space<vmem>>, vector<1x1x14xf32>
    %4 = vector.shape_cast %3 : vector<1x1x14xf32> to vector<1x14xf32>
    %c0_3 = arith.constant 0 : index
    %c0_4 = arith.constant 0 : index
    %5 = vector.load %arg8[%c0_3, %c0_4] : memref<1x32xf32, #tpu.memory_space<vmem>>, vector<1x32xf32>
    %c0_5 = arith.constant 0 : index
    %c0_6 = arith.constant 0 : index
    %6 = vector.load %arg6[%c0_5, %c0_6] : memref<3x102xf32, #tpu.memory_space<vmem>>, vector<3x102xf32>
    %7 = vector.extract_strided_slice %6 {offsets = [0, 0], sizes = [1, 102], strides = [1, 1]} : vector<3x102xf32> to vector<1x102xf32>
    %8 = vector.extract_strided_slice %6 {offsets = [1, 0], sizes = [1, 96], strides = [1, 1]} : vector<3x102xf32> to vector<1x96xf32>
    %9 = vector.extract_strided_slice %6 {offsets = [2, 0], sizes = [1, 11], strides = [1, 1]} : vector<3x102xf32> to vector<1x11xf32>
    %10 = tpu.concatenate %5, %4 in 1 : vector<1x32xf32>, vector<1x14xf32> -> vector<1x46xf32>
    %c0_7 = arith.constant 0 : index
    %c0_8 = arith.constant 0 : index
    %11 = vector.load %arg3[%c0_7, %c0_8] : memref<46x102xf32, #tpu.memory_space<vmem>>, vector<46x102xf32>
    %cst = arith.constant dense<0.000000e+00> : vector<1x102xf32>
    %12 = tpu.matmul %10, %11, %cst {dimension_numbers = #tpu.dot_dimension_numbers<[1], [0], [0], [1], [0, 0, 1, 1], [], []>} : vector<1x46xf32>, vector<46x102xf32>, vector<1x102xf32> -> vector<1x102xf32>
    %13 = arith.addf %12, %7 : vector<1x102xf32>
    %14 = vector.extract_strided_slice %13 {offsets = [0, 0], sizes = [1, 96], strides = [1, 1]} : vector<1x102xf32> to vector<1x96xf32>
    %15 = vector.extract_strided_slice %13 {offsets = [0, 96], sizes = [1, 6], strides = [1, 1]} : vector<1x102xf32> to vector<1x6xf32>
    %16 = arith.negf %15 : vector<1x6xf32>
    %17 = math.exp %16 : vector<1x6xf32>
    %cst_9 = arith.constant 1.000000e+00 : f32
    %18 = vector.broadcast %cst_9 : f32 to vector<1x6xf32>
    %19 = arith.addf %18, %17 : vector<1x6xf32>
    %20 = arith.divf %18, %19 : vector<1x6xf32>
    %cst_10 = arith.constant 1.000000e+00 : f32
    %21 = vector.broadcast %cst_10 : f32 to vector<1x8xf32>
    %22 = tpu.concatenate %21, %20 in 1 : vector<1x8xf32>, vector<1x6xf32> -> vector<1x14xf32>
    %23 = arith.mulf %4, %22 : vector<1x14xf32>
    %c0_11 = arith.constant 0 : index
    %c0_12 = arith.constant 0 : index
    %24 = vector.load %arg4[%c0_11, %c0_12] : memref<14x96xf32, #tpu.memory_space<vmem>>, vector<14x96xf32>
    %cst_13 = arith.constant dense<0.000000e+00> : vector<1x96xf32>
    %25 = tpu.matmul %23, %24, %cst_13 {dimension_numbers = #tpu.dot_dimension_numbers<[1], [0], [0], [1], [0, 0, 1, 1], [], []>} : vector<1x14xf32>, vector<14x96xf32>, vector<1x96xf32> -> vector<1x96xf32>
    %26 = arith.addf %25, %8 : vector<1x96xf32>
    %27 = vector.extract_strided_slice %26 {offsets = [0, 0], sizes = [1, 32], strides = [1, 1]} : vector<1x96xf32> to vector<1x32xf32>
    %28 = vector.extract_strided_slice %14 {offsets = [0, 0], sizes = [1, 32], strides = [1, 1]} : vector<1x96xf32> to vector<1x32xf32>
    %29 = arith.addf %27, %28 : vector<1x32xf32>
    %30 = arith.negf %29 : vector<1x32xf32>
    %31 = math.exp %30 : vector<1x32xf32>
    %cst_14 = arith.constant 1.000000e+00 : f32
    %32 = vector.broadcast %cst_14 : f32 to vector<1x32xf32>
    %33 = arith.addf %32, %31 : vector<1x32xf32>
    %34 = arith.divf %32, %33 : vector<1x32xf32>
    %35 = vector.extract_strided_slice %26 {offsets = [0, 32], sizes = [1, 32], strides = [1, 1]} : vector<1x96xf32> to vector<1x32xf32>
    %36 = vector.extract_strided_slice %14 {offsets = [0, 32], sizes = [1, 32], strides = [1, 1]} : vector<1x96xf32> to vector<1x32xf32>
    %37 = arith.addf %35, %36 : vector<1x32xf32>
    %38 = arith.negf %37 : vector<1x32xf32>
    %39 = math.exp %38 : vector<1x32xf32>
    %cst_15 = arith.constant 1.000000e+00 : f32
    %40 = vector.broadcast %cst_15 : f32 to vector<1x32xf32>
    %41 = arith.addf %40, %39 : vector<1x32xf32>
    %42 = arith.divf %40, %41 : vector<1x32xf32>
    %43 = vector.extract_strided_slice %26 {offsets = [0, 64], sizes = [1, 32], strides = [1, 1]} : vector<1x96xf32> to vector<1x32xf32>
    %44 = vector.extract_strided_slice %14 {offsets = [0, 64], sizes = [1, 32], strides = [1, 1]} : vector<1x96xf32> to vector<1x32xf32>
    %45 = arith.mulf %34, %44 : vector<1x32xf32>
    %46 = arith.addf %43, %45 : vector<1x32xf32>
    %47 = math.tanh %46 : vector<1x32xf32>
    %cst_16 = arith.constant 1.000000e+00 : f32
    %48 = vector.broadcast %cst_16 : f32 to vector<1x32xf32>
    %49 = arith.subf %48, %42 : vector<1x32xf32>
    %50 = arith.mulf %49, %47 : vector<1x32xf32>
    %51 = arith.mulf %42, %5 : vector<1x32xf32>
    %52 = arith.addf %50, %51 : vector<1x32xf32>
    %c0_17 = arith.constant 0 : index
    %c0_18 = arith.constant 0 : index
    %53 = vector.load %arg5[%c0_17, %c0_18] : memref<32x11xf32, #tpu.memory_space<vmem>>, vector<32x11xf32>
    %cst_19 = arith.constant dense<0.000000e+00> : vector<1x11xf32>
    %54 = tpu.matmul %52, %53, %cst_19 {dimension_numbers = #tpu.dot_dimension_numbers<[1], [0], [0], [1], [0, 0, 1, 1], [], []>} : vector<1x32xf32>, vector<32x11xf32>, vector<1x11xf32> -> vector<1x11xf32>
    %55 = arith.addf %54, %9 : vector<1x11xf32>
    %56 = vector.extract_strided_slice %55 {offsets = [0, 7], sizes = [1, 1], strides = [1, 1]} : vector<1x11xf32> to vector<1x1xf32>
    %57 = arith.negf %56 : vector<1x1xf32>
    %58 = math.exp %57 : vector<1x1xf32>
    %cst_20 = arith.constant 1.000000e+00 : f32
    %59 = vector.broadcast %cst_20 : f32 to vector<1x1xf32>
    %60 = arith.addf %59, %58 : vector<1x1xf32>
    %61 = arith.divf %59, %60 : vector<1x1xf32>
    %c0_21 = arith.constant 0 : index
    %c0_22 = arith.constant 0 : index
    %62 = vector.load %arg8[%c0_21, %c0_22] : memref<1x32xf32, #tpu.memory_space<vmem>>, vector<1x32xf32>
    tpu.vector_store %arg8[%c0_21, %c0_22], %52 {strides = array<i32>} : memref<1x32xf32, #tpu.memory_space<vmem>>, vector<1x32xf32>,
    %cst_23 = arith.constant 0.000000e+00 : f32
    %63 = vector.broadcast %cst_23 : f32 to vector<1x78xf32>
    %64 = tpu.concatenate %52, %20, %55, %61, %63 in 1 : vector<1x32xf32>, vector<1x6xf32>, vector<1x11xf32>, vector<1x1xf32>, vector<1x78xf32> -> vector<1x128xf32>
    %c0_24 = arith.constant 0 : index
    %c0_25 = arith.constant 0 : index
    %c0_26 = arith.constant 0 : index
    %65 = vector.load %arg7[%c0_24, %c0_25, %c0_26] : memref<1x1x128xf32, #tpu.memory_space<vmem>>, vector<1x1x128xf32>
    %66 = vector.shape_cast %65 : vector<1x1x128xf32> to vector<1x128xf32>
    %67 = vector.shape_cast %64 : vector<1x128xf32> to vector<1x1x128xf32>
    tpu.vector_store %arg7[%c0_24, %c0_25, %c0_26], %67 {strides = array<i32>} : memref<1x1x128xf32, #tpu.memory_space<vmem>>, vector<1x1x128xf32>,
    return
  }
  func.func @transform_0(%arg0: i32) -> (i32, i32, i32) {
    %c0_i32 = arith.constant 0 : i32
    %c0_i32_0 = arith.constant 0 : i32
    %c0_i32_1 = arith.constant 0 : i32
    return %arg0, %c0_i32, %c0_i32_0 : i32, i32, i32
  }
  func.func @transform_1(%arg0: i32) -> (i32, i32) {
    %c0_i32 = arith.constant 0 : i32
    %c0_i32_0 = arith.constant 0 : i32
    %c0_i32_1 = arith.constant 0 : i32
    return %c0_i32, %c0_i32_0 : i32, i32
  }
  func.func @transform_2(%arg0: i32) -> (i32, i32) {
    %c0_i32 = arith.constant 0 : i32
    %c0_i32_0 = arith.constant 0 : i32
    %c0_i32_1 = arith.constant 0 : i32
    return %c0_i32, %c0_i32_0 : i32, i32
  }
  func.func @transform_3(%arg0: i32) -> (i32, i32) {
    %c0_i32 = arith.constant 0 : i32
    %c0_i32_0 = arith.constant 0 : i32
    %c0_i32_1 = arith.constant 0 : i32
    return %c0_i32, %c0_i32_0 : i32, i32
  }
  func.func @transform_4(%arg0: i32) -> (i32, i32) {
    %c0_i32 = arith.constant 0 : i32
    %c0_i32_0 = arith.constant 0 : i32
    %c0_i32_1 = arith.constant 0 : i32
    return %c0_i32, %c0_i32_0 : i32, i32
  }
  func.func @transform_5(%arg0: i32) -> (i32, i32) {
    %c0_i32 = arith.constant 0 : i32
    %c0_i32_0 = arith.constant 0 : i32
    %c0_i32_1 = arith.constant 0 : i32
    return %c0_i32, %c0_i32_0 : i32, i32
  }
  func.func @transform_6(%arg0: i32) -> (i32, i32, i32) {
    %c0_i32 = arith.constant 0 : i32
    %c0_i32_0 = arith.constant 0 : i32
    %c0_i32_1 = arith.constant 0 : i32
    return %arg0, %c0_i32, %c0_i32_0 : i32, i32, i32
  }
}

</mosaic_0001>

<bundles_post_ra>
// kernel: online_gru_sequence.1
= control target key start
LH: loop header
LB: loop body
LE: loop exit
PB: predicated region body
PF: predicated region fallthrough
CT: control target
= control target key end

     0   :  { %11 = vsyncpa [#allocation4], 0  ;;  %s507_s21 = smov [#allocation3]   ;;  %s649_s0 = inlined_call_operand.vmem [shape: f32[1,1,14], index: 0, kind: input, shape index: {}]   ;;  %s650_s1 = inlined_call_operand.vmem [shape: f32[1,32], index: 1, kind: input, shape index: {}]   ;;  %s651_s2 = inlined_call_operand.vmem [shape: f32[46,102], index: 2, kind: input, shape index: {}]   ;;  %s652_s3 = inlined_call_operand.vmem [shape: f32[14,96], index: 3, kind: input, shape index: {}]   ;;  %s653_s4 = inlined_call_operand.vmem [shape: f32[32,11], index: 4, kind: input, shape index: {}]   ;;  %s654_s5 = inlined_call_operand.hbm [shape: f32[3,102], index: 5, kind: input, shape index: {}]   ;;  %s655_s6 = inlined_call_operand.vmem [shape: f32[1,1,128], index: 6, kind: output, shape index: {}]  }
   0x1   :  { %s28_s22 = sshll.u32 %s507_s21, 4  ;;  %s483_s25 = scalar_lea.hbm %s654_s5, 64  ;;  %s29_s22 = int_to_ptr.vmem [resolvable:$true] %s28_s22 }
   0x2   :  { %p484_p0 = scmp.ne.s32.totalorder %s654_s5, %s483_s25  ;;  %p487_p1 = scmp.lt.u32.totalorder %s483_s25, %s654_s5 }
   0x4   :  { %p489_p2 = pnand %p487_p1, %p484_p0 }
   0x6   :  { %492 = shalt.err (!%p489_p2)
}
   0x7   :  { %s493_s30 = scalar_lea.vmem %s29_s22, 64  ;;  %p498_p4 = scmp.lt.s32.totalorder %s29_s22, %s29_s22 }
   0x8   :  { %p494_p3 = scmp.ne.s32.totalorder %s29_s22, %s493_s30  ;;  %p499_p5 = scmp.lt.s32.totalorder %s493_s30, %s493_s30 }
   0xa   :  { %p500_p6 = por %p499_p5, %p498_p4 }
   0xc   :  { %p501_p7 = pnand %p500_p6, %p494_p3 }
   0xe   :  { %504 = shalt.err (!%p501_p7)
}
   0xf   :  { %31 = dma.hbm_to_vmem [thread:$0]  %s654_s5, 64, %s29_s22, [#allocation4]  }
  0x10   :  { %505 = dma.done.wait [#allocation4], 64  }
  0x11   :  { %506 = vsyncadd [#allocation4], 4294967232  ;;  %v46_v0 = vlaneseq  ;;  %v508_v1 = vmov 0.0|0.0   ;;  %vm509_vm0 = vmmov 0   ;;  %v510_v3 = vmov 0.0   ;;  %v55_v6 = vld [vmem:[%s651_s2] sm:$0xff] }
  0x12   :  { %438 = vmatprep.subr.bf16.mxu0 %v508_v1  ;;  %448 = vmatprep.subr.bf16.mxu1 %v508_v1  ;;  %v42_v5 = vld [vmem:[%s649_s0] sm:$0x1]  ;;  %v56_v7 = vld [vmem:[%s651_s2 + $0x8] sm:$0xff]  ;;  %vm40_vm1 = vcmask 253952   ;;  %v57_v10 = vld [vmem:[%s651_s2 + $0x10] sm:$0xff]  ;;  %s511_s19 = smov 32  }
  0x13   :  { %v567_v2 = vshrl.u32 %v46_v0, 7  ;;  %417 = vmatprep.mubr.msk.f32.mxu0 %vm509_vm0, %v510_v3  ;;  %424 = vmatprep.mubr.msk.f32.mxu1 %vm509_vm0, %v510_v3  ;;  %v439_v9 = vpack.c.bf16 %v56_v7, %v55_v6  ;;  %v58_v11 = vld [vmem:[%s651_s2 + $0x18] sm:$0xff]  ;;  %v39_v12 = vld [vmem:[%s650_s1] sm:$0x1]  ;;  %v60_v15 = vld [vmem:[%s651_s2 + $0x28] sm:$0x3f] }
  0x14   :  { %v442_v13 = vpack.c.bf16 %v58_v11, %v57_v10  ;;  %41 = vst.msk [vmem:[#allocation2] sm:$0x1] %vm40_vm1, %v39_v12  ;;  %v59_v14 = vld [vmem:[%s651_s2 + $0x20] sm:$0xff]  ;;  %vm65_vm2 = vcmask 1045504   ;;  %vm512_vm3 = vmmov 1   ;;  %vm53_vm5 = vcmask 261120  }
  0x15   :  { %v48_v4 = vsub.s32 0, %v567_v2  ;;  %440 = vmatpush3.bf16.msra.mxu0 %v439_v9  ;;  %v445_v16 = vpack.c.bf16 %v60_v15, %v59_v14  ;;  %vm602_vm4 = vmpackc.low %vm65_vm2, %vm512_vm3  ;;  %vm61_vm6 = vcmask 375808   ;;  %v609_v21 = vld [vmem:[#allocation3] sm:$0x7]  ;;  %s513_s1 = smov 64   ;;  %s514_s27 = smov 40  }
  0x16   :  { %441 = vmatprep.subr.bf16.mxu0 %v508_v1  ;;  %v152_v26 = vld [vmem:[%s652_s3] sm:$0xff]  ;;  %v153_v27 = vld [vmem:[%s652_s3 + $0x8] sm:$0x3f]  ;;  %vm149_vm7 = vcmask 64512   ;;  %vm157_vm8 = vcmask 113664   ;;  %v155_v35 = vrot.slane %v609_v21, 1 }
  0x17   :  { %v49_v8 = vrot.slane %v42_v5, %v48_v4  ;;  %v449_v28 = vpack.c.bf16 %v153_v27, %v152_v26  ;;  %v268_v49 = vld [vmem:[%s653_s4] sm:$0xff]  ;;  %v269_v50 = vld [vmem:[%s653_s4 + $0x8] sm:$0xff]  ;;  %v270_v51 = vld [vmem:[%s653_s4 + $0x10] sm:$0xff]  ;;  %s515_s10 = smov 96   ;;  %v275_v63 = vrot.slane %v609_v21, 2  ;;  %s517_s11 = smov 42  }
  0x18   :  { %v453_v52 = vpack.c.bf16 %v269_v50, %v268_v49  ;;  %v271_v53 = vld [vmem:[%s653_s4 + $0x18] sm:$0xff]  ;;  %s516_s4 = smov 38   ;;  %vm370_vm9 = vcmask 310272   ;;  %vm372_vm10 = vcmask 400384   ;;  %vm374_vm11 = vcmask 408576  }
  0x19   :  { %50 = vrot.lane.b32.xlu0 %v49_v8, %s511_s19  ;;  %443 = vmatpush3.bf16.msra.mxu0 %v442_v13  ;;  %v456_v54 = vpack.c.bf16 %v271_v53, %v270_v51 }
  0x1a   :  { %444 = vmatprep.subr.bf16.mxu0 %v508_v1  ;;  %451 = vmatpush3.bf16.msk.msra.mxu1 %vm602_vm4, %v449_v28 }
  0x1b   :  { %v43_v18 = vld [vmem:[#allocation2] sm:$0x1]  ;;  %452 = vmatprep.subr.bf16.mxu1 %v508_v1 }
  0x1c   :  { %v262_v46 = vrot.slane %v43_v18, %v48_v4 }
  0x1d   :  { %447 = vmatpush3.bf16.msk.msra.mxu0 %vm602_vm4, %v445_v16 }
  0x8b   :  { %v51_v19 = vpop.permute.xlu0 %50 }
  0x8c   :  { %v54_v20 = vsel %vm53_vm5, %v43_v18, %v51_v19 }
  0x8d   :  { %418 = vmatmul.mubr.msk.f32.vlgmr.msra.gmra.mrb[0].mxu0 %vm61_vm6, %v54_v20 }
 0x160   :  { %v135_v22 = vpop.f32.mrb[0].mxu0 }
 0x161   :  { %v136_v23 = vadd.f32 %v135_v22, %v609_v21  ;;  %v419_v24 = vpop.f32.mrb[1].mxu0 }
 0x163   :  { %v384_v25 = vmul.f32 -1.442695, %v136_v23  ;;  %242 = vrot.lane.b32.xlu1 %v136_v23, %s513_s1 }
 0x165   :  { %469 = vpow2.f32 %v384_v25 }
 0x16f   :  { %v470_v29 = vpop.eup %469 }
 0x170   :  { %v142_v30 = vadd.f32 1.0, %v470_v29 }
 0x172   :  { %471 = vrcp.f32 %v142_v30 }
 0x17c   :  { %v472_v31 = vpop.eup %471 }
 0x17d   :  { %146 = vrot.lane.b32.xlu0 %v472_v31, %s514_s27 }
 0x1d5   :  { %v243_v44 = vpop.permute.xlu1 %242 }
 0x1ef   :  { %v147_v32 = vpop.permute.xlu0 %146 }
 0x1f0   :  { %v150_v33 = vsel %vm149_vm7, 1.0, %v147_v32 }
 0x1f1   :  { %v151_v34 = vmul.f32 %v150_v33, %v42_v5 }
 0x1f3   :  { %425 = vmatmul.mubr.msk.f32.vlgmr.msra.gmra.mrb[0].mxu1 %vm157_vm8, %v151_v34 }
 0x1f4   :  { %435 = vmatprep.mubr.msk.f32.mxu1 %vm509_vm0, %v510_v3  ;;  %454 = vmatpush3.bf16.msra.mxu1 %v453_v52 }
 0x1f5   :  { %455 = vmatprep.subr.bf16.mxu1 %v508_v1 }
 0x1f8   :  { %457 = vmatpush3.bf16.msra.mxu1 %v456_v54 }
 0x2c6   :  { %v230_v36 = vpop.f32.mrb[0].mxu1 }
 0x2c7   :  { %v231_v37 = vadd.f32 %v230_v36, %v155_v35  ;;  %v426_v38 = vpop.f32.mrb[1].mxu1 }
 0x2c9   :  { %v234_v39 = vadd.f32 %v231_v37, %v136_v23 }
 0x2cb   :  { %v387_v40 = vmul.f32 -1.442695, %v234_v39 }
 0x2cd   :  { %473 = vpow2.f32 %v387_v40 }
 0x2d7   :  { %v474_v41 = vpop.eup %473 }
 0x2d8   :  { %v238_v42 = vadd.f32 1.0, %v474_v41 }
 0x2da   :  { %475 = vrcp.f32 %v238_v42 }
 0x2e4   :  { %v476_v43 = vpop.eup %475 }
 0x2e5   :  { %v245_v45 = vmul.f32 %v476_v43, %v243_v44  ;;  %v252_v57 = vsub.f32 1.0, %v476_v43 }
 0x2e7   :  { %247 = vrot.lane.b32.xlu1 %v245_v45, %s513_s1 }
 0x2eb   :  { %263 = vrot.lane.b32.xlu1 %v262_v46, %s511_s19 }
 0x2ef   :  { %358 = vrot.lane.b32.xlu1 %v472_v31, %s513_s1 }
 0x359   :  { %v248_v47 = vpop.permute.xlu1 %247 }
 0x35a   :  { %v250_v48 = vadd.f32 %v248_v47, %v231_v37 }
 0x35c   :  { %477 = vtanh.f32 %v250_v48 }
 0x35d   :  { %v264_v56 = vpop.permute.xlu1 %263 }
 0x35e   :  { %v266_v59 = vmul.f32 %v476_v43, %v264_v56 }
 0x361   :  { %v359_v7 = vpop.permute.xlu1 %358 }
 0x366   :  { %v478_v55 = vpop.eup %477 }
 0x367   :  { %254 = vrot.lane.b32.xlu0 %v478_v55, %s515_s10 }
 0x3d9   :  { %v255_v58 = vpop.permute.xlu0 %254 }
 0x3da   :  { %v257_v60 = vmul.f32 %v255_v58, %v252_v57 }
 0x3dc   :  { %v267_v61 = vadd.f32 %v266_v59, %v257_v60 }
 0x3de   :  { %273 = vrot.lane.b32.xlu0 %v267_v61, %s515_s10 }
 0x450   :  { %v274_v62 = vpop.permute.xlu0 %273 }
 0x451   :  { %357 = vst.msk [vmem:[#allocation2] sm:$0x1] %vm40_vm1, %v274_v62  ;;  %436 = vmatmul.mubr.msk.f32.vlgmr.msra.gmra.mrb[2].mxu1 %vm53_vm5, %v274_v62  ;;  %v369_v9 = vsel %vm53_vm5, %v274_v62, %v359_v7 }
 0x524   :  { %v345_v0 = vpop.f32.mrb[2].mxu1 }
 0x525   :  { %v346_v1 = vadd.f32 %v345_v0, %v275_v63  ;;  %v437_v2 = vpop.f32.mrb[3].mxu1 }
 0x527   :  { %v389_v3 = vmul.f32 -1.442695, %v346_v1  ;;  %362 = vrot.lane.b32.xlu0 %v346_v1, %s516_s4 }
 0x529   :  { %479 = vpow2.f32 %v389_v3 }
 0x533   :  { %v480_v4 = vpop.eup %479 }
 0x534   :  { %v352_v5 = vadd.f32 1.0, %v480_v4 }
 0x536   :  { %481 = vrcp.f32 %v352_v5 }
 0x540   :  { %v482_v6 = vpop.eup %481 }
 0x541   :  { %366 = vrot.lane.b32.xlu1 %v482_v6, %s517_s11 }
 0x599   :  { %v363_v8 = vpop.permute.xlu0 %362 }
 0x59a   :  { %v371_v10 = vsel %vm370_vm9, %v369_v9, %v363_v8 }
 0x5b3   :  { %v367_v11 = vpop.permute.xlu1 %366 }
 0x5b4   :  { %v373_v12 = vsel %vm372_vm10, %v371_v10, %v367_v11 }
 0x5b5   :  { %v375_v13 = vsel %vm374_vm11, %v373_v12, 0.0 }
 0x5b6   :  { %376 = vst [vmem:[%s655_s6] sm:$0x1] %v375_v13 }
 0x5b7   :  { %381 = vsyncpa [#allocation4], 1 }

</bundles_post_ra>
